<compile_context>
chip_gen: v7x
topology: tpu7x:2x2x1
jax: 0.10.0
libtpu: 0.0.40
codegen_flags: <defaults>
</compile_context>

<pallas_src>
import functools

import jax
import jax.numpy as jnp
from jax.experimental import pallas as pl
from jax.experimental.pallas import tpu as pltpu


def _maxout_tile_kernel(x_ref, w_ref, o_ref):
    """One grid step = one (D_in, TILE_D) weight tile of one of the k linear layers.

    x_ref : (B, D_in)       resident input (constant block index -> fetched once)
    w_ref : (D_in, TILE_D)  weight tile of layer j, read straight from the 3-D w
    o_ref : (1, TILE_D)     max over the batch of x @ W_tile  (f32)
    """
    # Single lane-dense MXU matmul with f32 accumulation.
    y = jnp.dot(x_ref[...], w_ref[...], preferred_element_type=jnp.float32)
    # Reduce over batch here; bias is added AFTER this max in the JAX epilogue
    # (bit-identical, and it removes a whole input DMA stream from the kernel).
    o_ref[...] = jnp.max(y, axis=0, keepdims=True)


def _pick_tile_d(d_in, d_out, itemsize, target_bytes=2 << 20):
    """Lane tile for D_out: ~2 MiB of weight per step, 256-aligned, capped at D_out."""
    t = (target_bytes // (itemsize * d_in)) // 256 * 256
    t = max(256, int(t))
    return d_out if t >= d_out else t


def maxout_init_bf16(w):
    """One-time (outside the per-step jit) cast of the weight stack for the bf16
    streaming fast path -- halves the dominant HBM weight traffic per call."""
    return w.astype(jnp.bfloat16)


@functools.partial(jax.jit, static_argnames=("tile_d",))
def maxout_forward(x, w, b, *, tile_d=None):
    """x: (B, D_in); w: (k, D_in, D_out); b: (k, D_out) f32  ->  (D_out,) f32.

    w may be f32 (exact parity with the PyTorch reference) or bf16 (pre-cast once
    via maxout_init_bf16); accumulation is always f32.
    """
    B, D_in = x.shape
    k, _, D_out = w.shape

    if x.dtype != w.dtype:           # tiny (B, D_in) cast; W itself is never copied
        x = x.astype(w.dtype)

    itemsize = jnp.dtype(w.dtype).itemsize
    if tile_d is None:
        tile_d = _pick_tile_d(D_in, D_out, itemsize)
    tile_d = min(tile_d, D_out)
    n_tiles = pl.cdiv(D_out, tile_d)

    # Explicit VMEM budget: resident x + double-buffered W tile + double-buffered
    # out tile, with headroom.  Clamped to stay safe on v7x's 64 MiB physical VMEM.
    vmem_needed = (2 * B * D_in * itemsize
                   + 2 * D_in * tile_d * itemsize
                   + 2 * tile_d * 4)
    vmem_limit = int(min(max(2 * vmem_needed + (4 << 20), 16 << 20), 40 << 20))

    cost = pl.CostEstimate(
        flops=2 * B * D_in * k * D_out,
        transcendentals=0,
        bytes_accessed=(B * D_in * itemsize          # x (read once, resident)
                        + k * D_in * D_out * itemsize  # W (read exactly once)
                        + k * D_out * 4),              # per-layer batch-max output
    )

    out = pl.pallas_call(
        _maxout_tile_kernel,
        out_shape=jax.ShapeDtypeStruct((k, 1, D_out), jnp.float32),
        grid_spec=pltpu.PrefetchScalarGridSpec(
            num_scalar_prefetch=0,
            grid=(k, n_tiles),
            in_specs=[
                # x: same block every step -> Pallas fetches it once and keeps it.
                pl.BlockSpec((B, D_in), lambda j, n: (0, 0)),
                # w: consumed directly from the 3-D (k, D_in, D_out) array, leading
                # dim squeezed, lane tile over D_out.  No repack, no padding.
                pl.BlockSpec((None, D_in, tile_d), lambda j, n: (j, 0, n)),
            ],
            out_specs=pl.BlockSpec((None, 1, tile_d), lambda j, n: (j, 0, n)),
        ),
        compiler_params=pltpu.CompilerParams(
            # Every (j, n) tile is independent -> both axes parallel (lets v7x
            # shard tiles across its two TensorCores; harmless on v5e/v6e).
            dimension_semantics=("parallel", "parallel"),
            vmem_limit_bytes=vmem_limit,
        ),
        cost_estimate=cost,
    )(x, w)                                           # (k, 1, D_out) f32

    # Epilogue on a few-KB array: bias after the batch max (bit-identical since the
    # bias is a per-column constant and max is monotone -- do NOT "fix" this), then
    # the k-way max.
    return jnp.max(out[:, 0, :] + b.astype(jnp.float32), axis=0)


def maxout_reference(x, w, b):
    """Plain-JAX reference mirroring the PyTorch forward exactly."""
    acts = [x @ w[j] + b[j] for j in range(w.shape[0])]   # k x (B, D_out)
    stacked = jnp.concatenate(acts, axis=0)               # (k*B, D_out) == vstack
    return jnp.max(stacked, axis=0)                       # (D_out,)


if __name__ == "__main__":
    def make_params(key, B, D_in, D_out, K):
        kx, kw, kb = jax.random.split(key, 3)
        x = jax.random.normal(kx, (B, D_in), dtype=jnp.float32)
        bound = 1.0 / float(D_in) ** 0.5
        w = jax.random.uniform(kw, (K, D_in, D_out), jnp.float32, -bound, bound)
        b = jax.random.uniform(kb, (K, D_out), jnp.float32, -bound, bound)
        return x, w, b

    # 1) Small shape matching the module spec (single lane tile per layer).
    x, w, b = make_params(jax.random.PRNGKey(0), B=8, D_in=32, D_out=16, K=4)
    out = jax.block_until_ready(maxout_forward(x, w, b))
    ref = maxout_reference(x, w, b)
    assert out.shape == (16,), out.shape
    assert jnp.allclose(out, ref, atol=1e-5, rtol=1e-5)

    # 2) Multi-tile grid over D_out: grid = (4, 2), 256-lane W tiles, no repack.
    x2, w2, b2 = make_params(jax.random.PRNGKey(1), B=8, D_in=128, D_out=512, K=4)
    out2 = jax.block_until_ready(maxout_forward(x2, w2, b2, tile_d=256))
    ref2 = maxout_reference(x2, w2, b2)
    assert out2.shape == (512,), out2.shape
    assert jnp.allclose(out2, ref2, atol=1e-5, rtol=1e-5)

    # 3) Non-dividing D_out: boundary tile handled by Pallas masking (no jnp.pad of W).
    x3, w3, b3 = make_params(jax.random.PRNGKey(2), B=8, D_in=128, D_out=320, K=4)
    out3 = jax.block_until_ready(maxout_forward(x3, w3, b3, tile_d=256))
    ref3 = maxout_reference(x3, w3, b3)
    assert out3.shape == (320,), out3.shape
    assert jnp.allclose(out3, ref3, atol=1e-5, rtol=1e-5)

    # 4) bf16 weight-streaming fast path: W pre-cast ONCE outside the jitted call.
    w2_bf16 = maxout_init_bf16(w2)
    out4 = jax.block_until_ready(maxout_forward(x2, w2_bf16, b2, tile_d=256))
    assert jnp.allclose(out4, ref2, atol=3e-2, rtol=3e-2)

    print("KERNEL_OK")
</pallas_src>

<mosaic_0001>
module attributes {stable_mosaic.version = 11 : i64} {
  func.func @_maxout_tile_kernel(%arg0: i32, %arg1: i32, %arg2: memref<8x32xf32, #tpu.memory_space<vmem>>, %arg3: memref<1x32x16xf32, #tpu.memory_space<vmem>>, %arg4: memref<1x1x16xf32, #tpu.memory_space<vmem>>) attributes {dimension_semantics = [#tpu.dimension_semantics<parallel>, #tpu.dimension_semantics<parallel>], iteration_bounds = array<i64: 4, 1>, scalar_prefetch = 0 : i64, scratch_operands = 0 : i64, tpu.core_type = #tpu.core_type<tc>, window_params = [{pipeline_mode = #tpu.pipeline_mode<synchronous>, transform_indices = @transform_0, window_bounds = array<i64: 8, 32>}, {transform_indices = @transform_1, window_bounds = array<i64: 1, 32, 16>}, {transform_indices = @transform_2, window_bounds = array<i64: 1, 1, 16>}]} {
    %c0 = arith.constant 0 : index
    %c0_0 = arith.constant 0 : index
    %0 = vector.load %arg2[%c0, %c0_0] : memref<8x32xf32, #tpu.memory_space<vmem>>, vector<8x32xf32>
    %c0_1 = arith.constant 0 : index
    %c0_2 = arith.constant 0 : index
    %c0_3 = arith.constant 0 : index
    %1 = vector.load %arg3[%c0_1, %c0_2, %c0_3] : memref<1x32x16xf32, #tpu.memory_space<vmem>>, vector<1x32x16xf32>
    %2 = vector.shape_cast %1 : vector<1x32x16xf32> to vector<32x16xf32>
    %cst = arith.constant dense<0.000000e+00> : vector<8x16xf32>
    %3 = tpu.matmul %0, %2, %cst {dimension_numbers = #tpu.dot_dimension_numbers<[1], [0], [0], [1], [0, 0, 1, 1], [], []>} : vector<8x32xf32>, vector<32x16xf32>, vector<8x16xf32> -> vector<8x16xf32>
    %cst_4 = arith.constant dense<0xFF800000> : vector<16xf32>
    %4 = vector.multi_reduction <maximumf>, %3, %cst_4 [0] : vector<8x16xf32> to vector<16xf32>
    %5 = vector.shape_cast %4 : vector<16xf32> to vector<1x16xf32>
    %c0_5 = arith.constant 0 : index
    %c0_6 = arith.constant 0 : index
    %c0_7 = arith.constant 0 : index
    %6 = vector.load %arg4[%c0_5, %c0_6, %c0_7] : memref<1x1x16xf32, #tpu.memory_space<vmem>>, vector<1x1x16xf32>
    %7 = vector.shape_cast %6 : vector<1x1x16xf32> to vector<1x16xf32>
    %8 = vector.shape_cast %5 : vector<1x16xf32> to vector<1x1x16xf32>
    tpu.vector_store %arg4[%c0_5, %c0_6, %c0_7], %8 {strides = array<i32>} : memref<1x1x16xf32, #tpu.memory_space<vmem>>, vector<1x1x16xf32>,
    return
  }
  func.func @transform_0(%arg0: i32, %arg1: i32) -> (i32, i32) {
    %c0_i32 = arith.constant 0 : i32
    %c0_i32_0 = arith.constant 0 : i32
    %c0_i32_1 = arith.constant 0 : i32
    return %c0_i32, %c0_i32_0 : i32, i32
  }
  func.func @transform_1(%arg0: i32, %arg1: i32) -> (i32, i32, i32) {
    %c0_i32 = arith.constant 0 : i32
    %c0_i32_0 = arith.constant 0 : i32
    return %arg0, %c0_i32, %arg1 : i32, i32, i32
  }
  func.func @transform_2(%arg0: i32, %arg1: i32) -> (i32, i32, i32) {
    %c0_i32 = arith.constant 0 : i32
    %c0_i32_0 = arith.constant 0 : i32
    return %arg0, %c0_i32, %arg1 : i32, i32, i32
  }
}

</mosaic_0001>

<bundles_post_ra>
// kernel: maxout_forward.1
= control target key start
LH: loop header
LB: loop body
LE: loop exit
PB: predicated region body
PF: predicated region fallthrough
CT: control target
= control target key end

     0   :  { %s433_s9 = smov 0   ;;  %s435_s10 = smov 0   ;;  %s469_s0 = inlined_call_operand.vmem [shape: f32[8,32], index: 0, kind: input, shape index: {}]   ;;  %s470_s1 = inlined_call_operand.vmem [shape: f32[4,32,16], index: 1, kind: input, shape index: {}]   ;;  %s471_s2 = inlined_call_operand.vmem [shape: f32[4,1,16], index: 2, kind: output, shape index: {}]  }
   0x1   :  { %s437_s11 = smov 0  }
   0x2 LB: > { %s24_s12 = sadd.s32 1, %s409_s10  ;;  %p335_p0 = scmp.ge.s32.totalorder %s413_s11, 1  ;;  %s413_s11 = sphi %s437_s11, %s12_s11   ;;  %s409_s10 = sphi %s435_s10, %s473_s10   ;;  %s405_s9 = sphi %s433_s9, %s472_s9  }
   0x3   : > { %p26_p1 = scmp.ge.s32.totalorder %s24_s12, 4  ;;  %p131_p2 = scmp.lt.s32.totalorder %s413_s11, 5 }
   0x5   : > { %s475_s12 = smov (%p26_p1, %s24_s12), 0  ;;  %p132_p3 = pnand %p335_p0, %p131_p2 }
   0x6   : > { %p157_p4 = scmp.lt.s32.totalorder (!%p132_p3), %s405_s9, 3  ;;  %v415_v0 = vmov (!%p132_p3), 0.0|0.0   ;;  %vm416_vm0 = vmmov (!%p132_p3), 0   ;;  %v417_v1 = vmov (!%p132_p3), 0.0   ;;  %v171_v8 = vld [vmem:[%s469_s0] sm:$0xff] (!%p132_p3)  ;;  %vm176_vm1 = vcmask (!%p132_p3), 261120  }
   0x7   : > { %135 = sbr.rel (%p132_p3) target bundleno = 253 (0xfd), region = 28  ;;  %358 = vmatprep.subr.bf16.mxu0 (!%p132_p3), %v415_v0  ;;  %355 = vmatprep.mubr.msk.f32.mxu0 (!%p132_p3), %vm416_vm0, %v417_v1  ;;  %vm250_vm2 = vcmask (!%p132_p3), 130048   ;;  %vm258_vm3 = vcmask (!%p132_p3), 122880  }
   0xe   : > { %s477_s9 = smov (!%p157_p4, %s405_s9), 3 }
   0xf   : > { %s341_s13 = sshll.u32 %s477_s9, 5  ;;  %s170_s21 = scalar_lea.vmem %s471_s2, %s477_s9 }
  0x10   : > { %s164_s16 = scalar_lea.vmem %s470_s1, %s341_s13 }
  0x11   : > { %v172_v2 = vld [vmem:[%s164_s16] sm:$0xff]  ;;  %v173_v3 = vld [vmem:[%s164_s16 + $0x8] sm:$0xff]  ;;  %v174_v4 = vld [vmem:[%s164_s16 + $0x10] sm:$0xff] }
  0x12   : > { %v359_v5 = vpack.c.bf16 %v173_v3, %v172_v2  ;;  %v175_v6 = vld [vmem:[%s164_s16 + $0x18] sm:$0xff] }
  0x13   : > { %v362_v7 = vpack.c.bf16 %v175_v6, %v174_v4 }
  0x14   : > { %360 = vmatpush3.bf16.msra.mxu0 %v359_v5 }
  0x15   : > { %361 = vmatprep.subr.bf16.mxu0 %v415_v0 }
  0x18   : > { %363 = vmatpush3.bf16.msra.mxu0 %v362_v7 }
  0x1b   : > { %356 = vmatmul.mubr.msk.f32.vlgmr.msra.gmra.mrb[0].mxu0 %vm176_vm1, %v171_v8 }
  0xee   : > { %v246_v9 = vpop.f32.mrb[0].mxu0 }
  0xef   : > { %v251_v10 = vsel %vm250_vm2, %v246_v9, -inf  ;;  %v357_v11 = vpop.f32.mrb[1].mxu0 }
  0xf0   : > { %v252_v12 = vrot.slane %v251_v10, 4 }
  0xf2   : > { %v253_v13 = vmax.f32 %v251_v10, %v252_v12 }
  0xf4   : > { %v254_v14 = vrot.slane %v253_v13, 2 }
  0xf6   : > { %v255_v15 = vmax.f32 %v253_v13, %v254_v14 }
  0xf8   : > { %v256_v16 = vrot.slane %v255_v15, 1 }
  0xfa   : > { %v257_v17 = vmax.f32 %v255_v15, %v256_v16 }
  0xfc   : > { %259 = vst.msk [vmem:[%s170_s21] sm:$0x1] %vm258_vm3, %v257_v17 }
  0xfd PF: > { %s12_s11 = sadd.s32 1, %s413_s11   ;;  %s472_s9 = smov %s409_s10 }
  0xfe   : > { %p9_p5 = scmp.ge.s32.totalorder %s12_s11, 6   ;;  %s473_s10 = smov %s475_s12 }
 0x100   :  { %11 = sbr.rel (!%p9_p5) target bundleno = 2 (0x2), region = 58 }

</bundles_post_ra>
